<compile_context>
chip_gen: v7x
topology: tpu7x:2x2x1
jax: 0.10.0
libtpu: 0.0.40
codegen_flags: <defaults>
</compile_context>

<pallas_src>
import jax
import jax.numpy as jnp
from jax import lax
from jax.experimental import pallas as pl
from jax.experimental.pallas import tpu as pltpu


def lstm_tagger_kernel(sent_ref, wih_ref, bg_ref, whh_ref, wtag_ref, btag_ref,
                       h0_ref, c0_ref, tags_ref, hn_ref, cn_ref, gx, hs):
    """Fused one-hot projection + LSTM recurrence + tag projection.

    sent_ref : (T*B, 1) int32  time-major token ids (row t*B+b = sentence[b,t])
    wih_ref  : (V, 4H) f32     W_ih^T, gate columns permuted to [i, f, o, g]
    bg_ref   : (1, 4H) f32     b_ih + b_hh, same permutation
    whh_ref  : (H, 4H) f32     W_hh^T, same permutation
    wtag_ref : (H, 128) f32    hidden2tag weight^T, zero-padded to 128 lanes
    btag_ref : (1, 128) f32    hidden2tag bias, zero-padded to 128 lanes
    h0/c0    : (B, H) f32      initial hidden state
    tags_ref : (T*B, 128) f32  lane-dense tag logits, time-major rows
    hn/cn    : (B, H) f32      final hidden state
    gx       : (T*B, 4H) f32   VMEM scratch: input projection + bias, all steps
    hs       : (T*B, H) f32    VMEM scratch: every h_t, time-major rows
    """
    TB, _ = gx.shape
    B, H = h0_ref.shape
    T = TB // B
    V = wih_ref.shape[0]

    # ---- Prologue: fused one-hot "embedding" + input projection (one MXU op).
    ids = sent_ref[...]                                          # (T*B, 1)
    onehot = jnp.where(
        ids == lax.broadcasted_iota(jnp.int32, (TB, V), 1),
        1.0, 0.0).astype(jnp.float32)                            # (T*B, V)
    gx[...] = (jnp.dot(onehot, wih_ref[...],
                       preferred_element_type=jnp.float32)
               + bg_ref[...])

    whh = whh_ref[...]          # hoisted: loaded once, reused every step

    # ---- Serial recurrence: only h @ W_hh^T + gate math is on the crit path.
    def step(t, carry):
        h, c = carry
        row = pl.multiple_of(t * B, B)
        gates = gx[pl.ds(row, B), :] + jnp.dot(
            h, whh, preferred_element_type=jnp.float32)          # (B, 4H)
        # One sigmoid + one tanh over the full (B, 128) vreg; gate layout is
        # [i | f | o | g], so lanes 0:3H of `s` and 3H:4H of `th` are used.
        s = jax.nn.sigmoid(gates)
        th = jnp.tanh(gates)
        i_g = s[:, 0 * H:1 * H]
        f_g = s[:, 1 * H:2 * H]
        o_g = s[:, 2 * H:3 * H]
        g_g = th[:, 3 * H:4 * H]
        c_new = f_g * c + i_g * g_g
        h_new = o_g * jnp.tanh(c_new)
        hs[pl.ds(row, B), :] = h_new
        return h_new, c_new

    h_fin, c_fin = lax.fori_loop(0, T, step, (h0_ref[...], c0_ref[...]),
                                 unroll=min(T, 8))
    hn_ref[...] = h_fin
    cn_ref[...] = c_fin

    # ---- Epilogue: one batched hidden2tag matmul over all timesteps, written
    # as a single lane-dense (T*B, 128) store (no masked partial vst).
    tags_ref[...] = (jnp.dot(hs[...], wtag_ref[...],
                             preferred_element_type=jnp.float32)
                     + btag_ref[...])


def lstm_tagger_forward(sentence, params, h0, c0):
    """Reproduces LSTMTagger.forward(sentence, hidden).

    sentence : int32 [B, T]
    h0, c0   : float32 [1, B, H]
    returns  : (tag_scores [T, B, TAG], (h_n [1,B,H], c_n [1,B,H]))
    """
    B, T = sentence.shape
    H = params["hidden_dim"]
    TAG = params["tagset_size"]
    TAGP = 128                                 # lane-dense padded tag width

    # Permute PyTorch gate order [i, f, g, o] -> [i, f, o, g] (trace-time, free)
    # so the kernel needs one sigmoid (lanes 0:3H) and one tanh (lanes 3H:4H).
    perm = jnp.concatenate([jnp.arange(0, 2 * H),
                            jnp.arange(3 * H, 4 * H),
                            jnp.arange(2 * H, 3 * H)])
    wih_t = params["w_ih"][perm].T                           # (V, 4H)
    whh_t = params["w_hh"][perm].T                           # (H, 4H)
    b_g = (params["b_ih"] + params["b_hh"])[perm].reshape(1, 4 * H)
    wtag_p = jnp.pad(params["w_tag"].T, ((0, 0), (0, TAGP - TAG)))       # (H,128)
    btag_p = jnp.pad(params["b_tag"].reshape(1, TAG), ((0, 0), (0, TAGP - TAG)))

    # Time-major flat id column (row t*B + b = sentence[b, t]).  256 B of int32:
    # negligible next to the (T,B,4H) gather/transpose chain it replaces.
    sent_tm = jnp.transpose(sentence).reshape(T * B, 1).astype(jnp.int32)

    vmem = pltpu.MemorySpace.VMEM
    logits_tm, h_n, c_n = pl.pallas_call(
        lstm_tagger_kernel,
        out_shape=(
            jax.ShapeDtypeStruct((T * B, TAGP), jnp.float32),
            jax.ShapeDtypeStruct((B, H), jnp.float32),
            jax.ShapeDtypeStruct((B, H), jnp.float32),
        ),
        in_specs=[pl.BlockSpec(memory_space=vmem)] * 8,
        out_specs=(
            pl.BlockSpec(memory_space=vmem),
            pl.BlockSpec(memory_space=vmem),
            pl.BlockSpec(memory_space=vmem),
        ),
        scratch_shapes=[pltpu.VMEM((T * B, 4 * H), jnp.float32),
                        pltpu.VMEM((T * B, H), jnp.float32)],
    )(sent_tm, wih_t, b_g, whh_t, wtag_p, btag_p, h0[0], c0[0])

    # PyTorch: hidden2tag(lstm_out.contiguous().view(T, B, -1)) where lstm_out
    # is batch-first [B, T, H].  The linear acts per row, so it equals applying
    # it per (t, b) step and reinterpreting the batch-first flat layout.  The
    # [:, :TAG] slice (drop lane padding) is needed anyway; XLA fuses the
    # transpose/reshape into the same tiny op.
    tags_tb = logits_tm[:, :TAG].reshape(T, B, TAG)          # time-major logits
    tags_bt = jnp.transpose(tags_tb, (1, 0, 2))              # [B, T, TAG]
    tag_scores = tags_bt.reshape(T, B, TAG)                  # the .view(T, B, -1)

    return tag_scores, (h_n[None], c_n[None])


def reference_forward(sentence, params, h0, c0):
    """Pure-JAX reference (lax.scan, explicit one-hot) for correctness."""
    B, T = sentence.shape
    V = params["vocab_size"]
    H = params["hidden_dim"]
    embeds = jax.nn.one_hot(sentence, V, dtype=jnp.float32)   # [B, T, V]
    x_tbv = jnp.transpose(embeds, (1, 0, 2))

    w_ih, w_hh = params["w_ih"], params["w_hh"]
    b = params["b_ih"] + params["b_hh"]

    def step(carry, x):
        h, c = carry
        gates = x @ w_ih.T + h @ w_hh.T + b
        i = jax.nn.sigmoid(gates[:, 0 * H:1 * H])
        f = jax.nn.sigmoid(gates[:, 1 * H:2 * H])
        g = jnp.tanh(gates[:, 2 * H:3 * H])
        o = jax.nn.sigmoid(gates[:, 3 * H:4 * H])
        c = f * c + i * g
        h = o * jnp.tanh(c)
        return (h, c), h

    (h_n, c_n), hs = lax.scan(step, (h0[0], c0[0]), x_tbv)
    lstm_out_bt = jnp.transpose(hs, (1, 0, 2))                # [B, T, H]
    flat = lstm_out_bt.reshape(T, B, H)
    tag_scores = flat @ params["w_tag"].T + params["b_tag"]
    return tag_scores, (h_n[None], c_n[None])


def init_params(key, vocab_size, hidden_dim, tagset_size):
    k = 1.0 / jnp.sqrt(hidden_dim)
    ks = jax.random.split(key, 6)
    u = lambda kk, shape: jax.random.uniform(kk, shape, jnp.float32, -k, k)
    return {
        "vocab_size": vocab_size,
        "hidden_dim": hidden_dim,
        "tagset_size": tagset_size,
        "w_ih": u(ks[0], (4 * hidden_dim, vocab_size)),
        "w_hh": u(ks[1], (4 * hidden_dim, hidden_dim)),
        "b_ih": u(ks[2], (4 * hidden_dim,)),
        "b_hh": u(ks[3], (4 * hidden_dim,)),
        "w_tag": u(ks[4], (tagset_size, hidden_dim)),
        "b_tag": u(ks[5], (tagset_size,)),
        # TODO(synk): nn.Embedding weights exist in __init__ but are never
        # used in forward (one_hot is used directly), so they are omitted.
    }


if __name__ == "__main__":
    B, T = 8, 8          # batch, sentencelen
    V = 16               # vocab_size == EMBEDDING_DIM
    H = 32               # hidden_dim  (4H = 128 -> lane-dense gates)
    TAG = 8              # tagset_size

    root = jax.random.PRNGKey(0)
    k_param, k_sent = jax.random.split(root)

    params = init_params(k_param, V, H, TAG)
    sentence = jax.random.randint(k_sent, (B, T), 0, V, dtype=jnp.int32)
    h0 = jnp.zeros((1, B, H), jnp.float32)
    c0 = jnp.zeros((1, B, H), jnp.float32)

    tag_scores, (h_n, c_n) = lstm_tagger_forward(sentence, params, h0, c0)
    jax.block_until_ready((tag_scores, h_n, c_n))

    ref_scores, (ref_h, ref_c) = reference_forward(sentence, params, h0, c0)
    assert tag_scores.shape == (T, B, TAG)
    assert h_n.shape == (1, B, H) and c_n.shape == (1, B, H)
    assert jnp.allclose(tag_scores, ref_scores, atol=2e-5, rtol=2e-5)
    assert jnp.allclose(h_n, ref_h, atol=2e-5, rtol=2e-5)
    assert jnp.allclose(c_n, ref_c, atol=2e-5, rtol=2e-5)

    print("KERNEL_OK")
</pallas_src>

<mosaic_0001>
module attributes {stable_mosaic.version = 11 : i64} {
  func.func @lstm_tagger_kernel(%arg0: memref<64x1xi32, #tpu.memory_space<vmem>>, %arg1: memref<16x128xf32, #tpu.memory_space<vmem>>, %arg2: memref<1x128xf32, #tpu.memory_space<vmem>>, %arg3: memref<32x128xf32, #tpu.memory_space<vmem>>, %arg4: memref<32x128xf32, #tpu.memory_space<vmem>>, %arg5: memref<1x128xf32, #tpu.memory_space<vmem>>, %arg6: memref<8x32xf32, #tpu.memory_space<vmem>>, %arg7: memref<8x32xf32, #tpu.memory_space<vmem>>, %arg8: memref<64x128xf32, #tpu.memory_space<vmem>>, %arg9: memref<8x32xf32, #tpu.memory_space<vmem>>, %arg10: memref<8x32xf32, #tpu.memory_space<vmem>>, %arg11: memref<64x128xf32, #tpu.memory_space<vmem>>, %arg12: memref<64x32xf32, #tpu.memory_space<vmem>>) attributes {dimension_semantics = [], scalar_prefetch = 0 : i64, scratch_operands = 2 : i64, tpu.core_type = #tpu.core_type<tc>} {
    %c0 = arith.constant 0 : index
    %c0_0 = arith.constant 0 : index
    %0 = vector.load %arg0[%c0, %c0_0] : memref<64x1xi32, #tpu.memory_space<vmem>>, vector<64x1xi32>
    %1 = tpu.iota {dimensions = array<i32: 1>} : vector<64x16xi32>
    %2 = vector.broadcast %0 : vector<64x1xi32> to vector<64x16xi32>
    %3 = arith.cmpi eq, %2, %1 : vector<64x16xi32>
    %cst = arith.constant 1.000000e+00 : f32
    %cst_1 = arith.constant 0.000000e+00 : f32
    %4 = vector.broadcast %cst : f32 to vector<64x16xf32>
    %5 = vector.broadcast %cst_1 : f32 to vector<64x16xf32>
    %6 = arith.select %3, %4, %5 : vector<64x16xi1>, vector<64x16xf32>
    %c0_2 = arith.constant 0 : index
    %c0_3 = arith.constant 0 : index
    %7 = vector.load %arg1[%c0_2, %c0_3] : memref<16x128xf32, #tpu.memory_space<vmem>>, vector<16x128xf32>
    %cst_4 = arith.constant dense<0.000000e+00> : vector<64x128xf32>
    %8 = tpu.matmul %6, %7, %cst_4 {dimension_numbers = #tpu.dot_dimension_numbers<[1], [0], [0], [1], [0, 0, 1, 1], [], []>} : vector<64x16xf32>, vector<16x128xf32>, vector<64x128xf32> -> vector<64x128xf32>
    %c0_5 = arith.constant 0 : index
    %c0_6 = arith.constant 0 : index
    %9 = vector.load %arg2[%c0_5, %c0_6] : memref<1x128xf32, #tpu.memory_space<vmem>>, vector<1x128xf32>
    %10 = vector.broadcast %9 : vector<1x128xf32> to vector<64x128xf32>
    %11 = arith.addf %8, %10 : vector<64x128xf32>
    %c0_7 = arith.constant 0 : index
    %c0_8 = arith.constant 0 : index
    %12 = vector.load %arg11[%c0_7, %c0_8] : memref<64x128xf32, #tpu.memory_space<vmem>>, vector<64x128xf32>
    tpu.vector_store %arg11[%c0_7, %c0_8], %11 {strides = array<i32>} : memref<64x128xf32, #tpu.memory_space<vmem>>, vector<64x128xf32>,
    %c0_9 = arith.constant 0 : index
    %c0_10 = arith.constant 0 : index
    %13 = vector.load %arg3[%c0_9, %c0_10] : memref<32x128xf32, #tpu.memory_space<vmem>>, vector<32x128xf32>
    %c0_11 = arith.constant 0 : index
    %c0_12 = arith.constant 0 : index
    %14 = vector.load %arg6[%c0_11, %c0_12] : memref<8x32xf32, #tpu.memory_space<vmem>>, vector<8x32xf32>
    %c0_13 = arith.constant 0 : index
    %c0_14 = arith.constant 0 : index
    %15 = vector.load %arg7[%c0_13, %c0_14] : memref<8x32xf32, #tpu.memory_space<vmem>>, vector<8x32xf32>
    %c0_i32 = arith.constant 0 : i32
    %c8_i32 = arith.constant 8 : i32
    %16 = arith.muli %c0_i32, %c8_i32 : i32
    %17 = tpu.assume_multiple %16, 8 : i32
    %18 = arith.index_cast %17 : i32 to index
    %c0_15 = arith.constant 0 : index
    %19 = vector.load %arg11[%18, %c0_15] : memref<64x128xf32, #tpu.memory_space<vmem>>, vector<8x128xf32>
    %cst_16 = arith.constant dense<0.000000e+00> : vector<8x128xf32>
    %20 = tpu.matmul %14, %13, %cst_16 {dimension_numbers = #tpu.dot_dimension_numbers<[1], [0], [0], [1], [0, 0, 1, 1], [], []>} : vector<8x32xf32>, vector<32x128xf32>, vector<8x128xf32> -> vector<8x128xf32>
    %21 = arith.addf %19, %20 : vector<8x128xf32>
    %22 = arith.negf %21 : vector<8x128xf32>
    %23 = math.exp %22 : vector<8x128xf32>
    %cst_17 = arith.constant 1.000000e+00 : f32
    %24 = vector.broadcast %cst_17 : f32 to vector<8x128xf32>
    %25 = arith.addf %24, %23 : vector<8x128xf32>
    %26 = arith.divf %24, %25 : vector<8x128xf32>
    %27 = math.tanh %21 : vector<8x128xf32>
    %28 = vector.extract_strided_slice %26 {offsets = [0, 0], sizes = [8, 32], strides = [1, 1]} : vector<8x128xf32> to vector<8x32xf32>
    %29 = vector.extract_strided_slice %26 {offsets = [0, 32], sizes = [8, 32], strides = [1, 1]} : vector<8x128xf32> to vector<8x32xf32>
    %30 = vector.extract_strided_slice %26 {offsets = [0, 64], sizes = [8, 32], strides = [1, 1]} : vector<8x128xf32> to vector<8x32xf32>
    %31 = vector.extract_strided_slice %27 {offsets = [0, 96], sizes = [8, 32], strides = [1, 1]} : vector<8x128xf32> to vector<8x32xf32>
    %32 = arith.mulf %29, %15 : vector<8x32xf32>
    %33 = arith.mulf %28, %31 : vector<8x32xf32>
    %34 = arith.addf %32, %33 : vector<8x32xf32>
    %35 = math.tanh %34 : vector<8x32xf32>
    %36 = arith.mulf %30, %35 : vector<8x32xf32>
    %37 = arith.index_cast %17 : i32 to index
    %c0_18 = arith.constant 0 : index
    %38 = vector.load %arg12[%37, %c0_18] : memref<64x32xf32, #tpu.memory_space<vmem>>, vector<8x32xf32>
    tpu.vector_store %arg12[%37, %c0_18], %36 {strides = array<i32>} : memref<64x32xf32, #tpu.memory_space<vmem>>, vector<8x32xf32>,
    %c1_i32 = arith.constant 1 : i32
    %c8_i32_19 = arith.constant 8 : i32
    %39 = arith.muli %c1_i32, %c8_i32_19 : i32
    %40 = tpu.assume_multiple %39, 8 : i32
    %41 = arith.index_cast %40 : i32 to index
    %c0_20 = arith.constant 0 : index
    %42 = vector.load %arg11[%41, %c0_20] : memref<64x128xf32, #tpu.memory_space<vmem>>, vector<8x128xf32>
    %cst_21 = arith.constant dense<0.000000e+00> : vector<8x128xf32>
    %43 = tpu.matmul %36, %13, %cst_21 {dimension_numbers = #tpu.dot_dimension_numbers<[1], [0], [0], [1], [0, 0, 1, 1], [], []>} : vector<8x32xf32>, vector<32x128xf32>, vector<8x128xf32> -> vector<8x128xf32>
    %44 = arith.addf %42, %43 : vector<8x128xf32>
    %45 = arith.negf %44 : vector<8x128xf32>
    %46 = math.exp %45 : vector<8x128xf32>
    %cst_22 = arith.constant 1.000000e+00 : f32
    %47 = vector.broadcast %cst_22 : f32 to vector<8x128xf32>
    %48 = arith.addf %47, %46 : vector<8x128xf32>
    %49 = arith.divf %47, %48 : vector<8x128xf32>
    %50 = math.tanh %44 : vector<8x128xf32>
    %51 = vector.extract_strided_slice %49 {offsets = [0, 0], sizes = [8, 32], strides = [1, 1]} : vector<8x128xf32> to vector<8x32xf32>
    %52 = vector.extract_strided_slice %49 {offsets = [0, 32], sizes = [8, 32], strides = [1, 1]} : vector<8x128xf32> to vector<8x32xf32>
    %53 = vector.extract_strided_slice %49 {offsets = [0, 64], sizes = [8, 32], strides = [1, 1]} : vector<8x128xf32> to vector<8x32xf32>
    %54 = vector.extract_strided_slice %50 {offsets = [0, 96], sizes = [8, 32], strides = [1, 1]} : vector<8x128xf32> to vector<8x32xf32>
    %55 = arith.mulf %52, %34 : vector<8x32xf32>
    %56 = arith.mulf %51, %54 : vector<8x32xf32>
    %57 = arith.addf %55, %56 : vector<8x32xf32>
    %58 = math.tanh %57 : vector<8x32xf32>
    %59 = arith.mulf %53, %58 : vector<8x32xf32>
    %60 = arith.index_cast %40 : i32 to index
    %c0_23 = arith.constant 0 : index
    %61 = vector.load %arg12[%60, %c0_23] : memref<64x32xf32, #tpu.memory_space<vmem>>, vector<8x32xf32>
    tpu.vector_store %arg12[%60, %c0_23], %59 {strides = array<i32>} : memref<64x32xf32, #tpu.memory_space<vmem>>, vector<8x32xf32>,
    %c2_i32 = arith.constant 2 : i32
    %c8_i32_24 = arith.constant 8 : i32
    %62 = arith.muli %c2_i32, %c8_i32_24 : i32
    %63 = tpu.assume_multiple %62, 8 : i32
    %64 = arith.index_cast %63 : i32 to index
    %c0_25 = arith.constant 0 : index
    %65 = vector.load %arg11[%64, %c0_25] : memref<64x128xf32, #tpu.memory_space<vmem>>, vector<8x128xf32>
    %cst_26 = arith.constant dense<0.000000e+00> : vector<8x128xf32>
    %66 = tpu.matmul %59, %13, %cst_26 {dimension_numbers = #tpu.dot_dimension_numbers<[1], [0], [0], [1], [0, 0, 1, 1], [], []>} : vector<8x32xf32>, vector<32x128xf32>, vector<8x128xf32> -> vector<8x128xf32>
    %67 = arith.addf %65, %66 : vector<8x128xf32>
    %68 = arith.negf %67 : vector<8x128xf32>
    %69 = math.exp %68 : vector<8x128xf32>
    %cst_27 = arith.constant 1.000000e+00 : f32
    %70 = vector.broadcast %cst_27 : f32 to vector<8x128xf32>
    %71 = arith.addf %70, %69 : vector<8x128xf32>
    %72 = arith.divf %70, %71 : vector<8x128xf32>
    %73 = math.tanh %67 : vector<8x128xf32>
    %74 = vector.extract_strided_slice %72 {offsets = [0, 0], sizes = [8, 32], strides = [1, 1]} : vector<8x128xf32> to vector<8x32xf32>
    %75 = vector.extract_strided_slice %72 {offsets = [0, 32], sizes = [8, 32], strides = [1, 1]} : vector<8x128xf32> to vector<8x32xf32>
    %76 = vector.extract_strided_slice %72 {offsets = [0, 64], sizes = [8, 32], strides = [1, 1]} : vector<8x128xf32> to vector<8x32xf32>
    %77 = vector.extract_strided_slice %73 {offsets = [0, 96], sizes = [8, 32], strides = [1, 1]} : vector<8x128xf32> to vector<8x32xf32>
    %78 = arith.mulf %75, %57 : vector<8x32xf32>
    %79 = arith.mulf %74, %77 : vector<8x32xf32>
    %80 = arith.addf %78, %79 : vector<8x32xf32>
    %81 = math.tanh %80 : vector<8x32xf32>
    %82 = arith.mulf %76, %81 : vector<8x32xf32>
    %83 = arith.index_cast %63 : i32 to index
    %c0_28 = arith.constant 0 : index
    %84 = vector.load %arg12[%83, %c0_28] : memref<64x32xf32, #tpu.memory_space<vmem>>, vector<8x32xf32>
    tpu.vector_store %arg12[%83, %c0_28], %82 {strides = array<i32>} : memref<64x32xf32, #tpu.memory_space<vmem>>, vector<8x32xf32>,
    %c3_i32 = arith.constant 3 : i32
    %c8_i32_29 = arith.constant 8 : i32
    %85 = arith.muli %c3_i32, %c8_i32_29 : i32
    %86 = tpu.assume_multiple %85, 8 : i32
    %87 = arith.index_cast %86 : i32 to index
    %c0_30 = arith.constant 0 : index
    %88 = vector.load %arg11[%87, %c0_30] : memref<64x128xf32, #tpu.memory_space<vmem>>, vector<8x128xf32>
    %cst_31 = arith.constant dense<0.000000e+00> : vector<8x128xf32>
    %89 = tpu.matmul %82, %13, %cst_31 {dimension_numbers = #tpu.dot_dimension_numbers<[1], [0], [0], [1], [0, 0, 1, 1], [], []>} : vector<8x32xf32>, vector<32x128xf32>, vector<8x128xf32> -> vector<8x128xf32>
    %90 = arith.addf %88, %89 : vector<8x128xf32>
    %91 = arith.negf %90 : vector<8x128xf32>
    %92 = math.exp %91 : vector<8x128xf32>
    %cst_32 = arith.constant 1.000000e+00 : f32
    %93 = vector.broadcast %cst_32 : f32 to vector<8x128xf32>
    %94 = arith.addf %93, %92 : vector<8x128xf32>
    %95 = arith.divf %93, %94 : vector<8x128xf32>
    %96 = math.tanh %90 : vector<8x128xf32>
    %97 = vector.extract_strided_slice %95 {offsets = [0, 0], sizes = [8, 32], strides = [1, 1]} : vector<8x128xf32> to vector<8x32xf32>
    %98 = vector.extract_strided_slice %95 {offsets = [0, 32], sizes = [8, 32], strides = [1, 1]} : vector<8x128xf32> to vector<8x32xf32>
    %99 = vector.extract_strided_slice %95 {offsets = [0, 64], sizes = [8, 32], strides = [1, 1]} : vector<8x128xf32> to vector<8x32xf32>
    %100 = vector.extract_strided_slice %96 {offsets = [0, 96], sizes = [8, 32], strides = [1, 1]} : vector<8x128xf32> to vector<8x32xf32>
    %101 = arith.mulf %98, %80 : vector<8x32xf32>
    %102 = arith.mulf %97, %100 : vector<8x32xf32>
    %103 = arith.addf %101, %102 : vector<8x32xf32>
    %104 = math.tanh %103 : vector<8x32xf32>
    %105 = arith.mulf %99, %104 : vector<8x32xf32>
    %106 = arith.index_cast %86 : i32 to index
    %c0_33 = arith.constant 0 : index
    %107 = vector.load %arg12[%106, %c0_33] : memref<64x32xf32, #tpu.memory_space<vmem>>, vector<8x32xf32>
    tpu.vector_store %arg12[%106, %c0_33], %105 {strides = array<i32>} : memref<64x32xf32, #tpu.memory_space<vmem>>, vector<8x32xf32>,
    %c4_i32 = arith.constant 4 : i32
    %c8_i32_34 = arith.constant 8 : i32
    %108 = arith.muli %c4_i32, %c8_i32_34 : i32
    %109 = tpu.assume_multiple %108, 8 : i32
    %110 = arith.index_cast %109 : i32 to index
    %c0_35 = arith.constant 0 : index
    %111 = vector.load %arg11[%110, %c0_35] : memref<64x128xf32, #tpu.memory_space<vmem>>, vector<8x128xf32>
    %cst_36 = arith.constant dense<0.000000e+00> : vector<8x128xf32>
    %112 = tpu.matmul %105, %13, %cst_36 {dimension_numbers = #tpu.dot_dimension_numbers<[1], [0], [0], [1], [0, 0, 1, 1], [], []>} : vector<8x32xf32>, vector<32x128xf32>, vector<8x128xf32> -> vector<8x128xf32>
    %113 = arith.addf %111, %112 : vector<8x128xf32>
    %114 = arith.negf %113 : vector<8x128xf32>
    %115 = math.exp %114 : vector<8x128xf32>
    %cst_37 = arith.constant 1.000000e+00 : f32
    %116 = vector.broadcast %cst_37 : f32 to vector<8x128xf32>
    %117 = arith.addf %116, %115 : vector<8x128xf32>
    %118 = arith.divf %116, %117 : vector<8x128xf32>
    %119 = math.tanh %113 : vector<8x128xf32>
    %120 = vector.extract_strided_slice %118 {offsets = [0, 0], sizes = [8, 32], strides = [1, 1]} : vector<8x128xf32> to vector<8x32xf32>
    %121 = vector.extract_strided_slice %118 {offsets = [0, 32], sizes = [8, 32], strides = [1, 1]} : vector<8x128xf32> to vector<8x32xf32>
    %122 = vector.extract_strided_slice %118 {offsets = [0, 64], sizes = [8, 32], strides = [1, 1]} : vector<8x128xf32> to vector<8x32xf32>
    %123 = vector.extract_strided_slice %119 {offsets = [0, 96], sizes = [8, 32], strides = [1, 1]} : vector<8x128xf32> to vector<8x32xf32>
    %124 = arith.mulf %121, %103 : vector<8x32xf32>
    %125 = arith.mulf %120, %123 : vector<8x32xf32>
    %126 = arith.addf %124, %125 : vector<8x32xf32>
    %127 = math.tanh %126 : vector<8x32xf32>
    %128 = arith.mulf %122, %127 : vector<8x32xf32>
    %129 = arith.index_cast %109 : i32 to index
    %c0_38 = arith.constant 0 : index
    %130 = vector.load %arg12[%129, %c0_38] : memref<64x32xf32, #tpu.memory_space<vmem>>, vector<8x32xf32>
    tpu.vector_store %arg12[%129, %c0_38], %128 {strides = array<i32>} : memref<64x32xf32, #tpu.memory_space<vmem>>, vector<8x32xf32>,
    %c5_i32 = arith.constant 5 : i32
    %c8_i32_39 = arith.constant 8 : i32
    %131 = arith.muli %c5_i32, %c8_i32_39 : i32
    %132 = tpu.assume_multiple %131, 8 : i32
    %133 = arith.index_cast %132 : i32 to index
    %c0_40 = arith.constant 0 : index
    %134 = vector.load %arg11[%133, %c0_40] : memref<64x128xf32, #tpu.memory_space<vmem>>, vector<8x128xf32>
    %cst_41 = arith.constant dense<0.000000e+00> : vector<8x128xf32>
    %135 = tpu.matmul %128, %13, %cst_41 {dimension_numbers = #tpu.dot_dimension_numbers<[1], [0], [0], [1], [0, 0, 1, 1], [], []>} : vector<8x32xf32>, vector<32x128xf32>, vector<8x128xf32> -> vector<8x128xf32>
    %136 = arith.addf %134, %135 : vector<8x128xf32>
    %137 = arith.negf %136 : vector<8x128xf32>
    %138 = math.exp %137 : vector<8x128xf32>
    %cst_42 = arith.constant 1.000000e+00 : f32
    %139 = vector.broadcast %cst_42 : f32 to vector<8x128xf32>
    %140 = arith.addf %139, %138 : vector<8x128xf32>
    %141 = arith.divf %139, %140 : vector<8x128xf32>
    %142 = math.tanh %136 : vector<8x128xf32>
    %143 = vector.extract_strided_slice %141 {offsets = [0, 0], sizes = [8, 32], strides = [1, 1]} : vector<8x128xf32> to vector<8x32xf32>
    %144 = vector.extract_strided_slice %141 {offsets = [0, 32], sizes = [8, 32], strides = [1, 1]} : vector<8x128xf32> to vector<8x32xf32>
    %145 = vector.extract_strided_slice %141 {offsets = [0, 64], sizes = [8, 32], strides = [1, 1]} : vector<8x128xf32> to vector<8x32xf32>
    %146 = vector.extract_strided_slice %142 {offsets = [0, 96], sizes = [8, 32], strides = [1, 1]} : vector<8x128xf32> to vector<8x32xf32>
    %147 = arith.mulf %144, %126 : vector<8x32xf32>
    %148 = arith.mulf %143, %146 : vector<8x32xf32>
    %149 = arith.addf %147, %148 : vector<8x32xf32>
    %150 = math.tanh %149 : vector<8x32xf32>
    %151 = arith.mulf %145, %150 : vector<8x32xf32>
    %152 = arith.index_cast %132 : i32 to index
    %c0_43 = arith.constant 0 : index
    %153 = vector.load %arg12[%152, %c0_43] : memref<64x32xf32, #tpu.memory_space<vmem>>, vector<8x32xf32>
    tpu.vector_store %arg12[%152, %c0_43], %151 {strides = array<i32>} : memref<64x32xf32, #tpu.memory_space<vmem>>, vector<8x32xf32>,
    %c6_i32 = arith.constant 6 : i32
    %c8_i32_44 = arith.constant 8 : i32
    %154 = arith.muli %c6_i32, %c8_i32_44 : i32
    %155 = tpu.assume_multiple %154, 8 : i32
    %156 = arith.index_cast %155 : i32 to index
    %c0_45 = arith.constant 0 : index
    %157 = vector.load %arg11[%156, %c0_45] : memref<64x128xf32, #tpu.memory_space<vmem>>, vector<8x128xf32>
    %cst_46 = arith.constant dense<0.000000e+00> : vector<8x128xf32>
    %158 = tpu.matmul %151, %13, %cst_46 {dimension_numbers = #tpu.dot_dimension_numbers<[1], [0], [0], [1], [0, 0, 1, 1], [], []>} : vector<8x32xf32>, vector<32x128xf32>, vector<8x128xf32> -> vector<8x128xf32>
    %159 = arith.addf %157, %158 : vector<8x128xf32>
    %160 = arith.negf %159 : vector<8x128xf32>
    %161 = math.exp %160 : vector<8x128xf32>
    %cst_47 = arith.constant 1.000000e+00 : f32
    %162 = vector.broadcast %cst_47 : f32 to vector<8x128xf32>
    %163 = arith.addf %162, %161 : vector<8x128xf32>
    %164 = arith.divf %162, %163 : vector<8x128xf32>
    %165 = math.tanh %159 : vector<8x128xf32>
    %166 = vector.extract_strided_slice %164 {offsets = [0, 0], sizes = [8, 32], strides = [1, 1]} : vector<8x128xf32> to vector<8x32xf32>
    %167 = vector.extract_strided_slice %164 {offsets = [0, 32], sizes = [8, 32], strides = [1, 1]} : vector<8x128xf32> to vector<8x32xf32>
    %168 = vector.extract_strided_slice %164 {offsets = [0, 64], sizes = [8, 32], strides = [1, 1]} : vector<8x128xf32> to vector<8x32xf32>
    %169 = vector.extract_strided_slice %165 {offsets = [0, 96], sizes = [8, 32], strides = [1, 1]} : vector<8x128xf32> to vector<8x32xf32>
    %170 = arith.mulf %167, %149 : vector<8x32xf32>
    %171 = arith.mulf %166, %169 : vector<8x32xf32>
    %172 = arith.addf %170, %171 : vector<8x32xf32>
    %173 = math.tanh %172 : vector<8x32xf32>
    %174 = arith.mulf %168, %173 : vector<8x32xf32>
    %175 = arith.index_cast %155 : i32 to index
    %c0_48 = arith.constant 0 : index
    %176 = vector.load %arg12[%175, %c0_48] : memref<64x32xf32, #tpu.memory_space<vmem>>, vector<8x32xf32>
    tpu.vector_store %arg12[%175, %c0_48], %174 {strides = array<i32>} : memref<64x32xf32, #tpu.memory_space<vmem>>, vector<8x32xf32>,
    %c7_i32 = arith.constant 7 : i32
    %c8_i32_49 = arith.constant 8 : i32
    %177 = arith.muli %c7_i32, %c8_i32_49 : i32
    %178 = tpu.assume_multiple %177, 8 : i32
    %179 = arith.index_cast %178 : i32 to index
    %c0_50 = arith.constant 0 : index
    %180 = vector.load %arg11[%179, %c0_50] : memref<64x128xf32, #tpu.memory_space<vmem>>, vector<8x128xf32>
    %cst_51 = arith.constant dense<0.000000e+00> : vector<8x128xf32>
    %181 = tpu.matmul %174, %13, %cst_51 {dimension_numbers = #tpu.dot_dimension_numbers<[1], [0], [0], [1], [0, 0, 1, 1], [], []>} : vector<8x32xf32>, vector<32x128xf32>, vector<8x128xf32> -> vector<8x128xf32>
    %182 = arith.addf %180, %181 : vector<8x128xf32>
    %183 = arith.negf %182 : vector<8x128xf32>
    %184 = math.exp %183 : vector<8x128xf32>
    %cst_52 = arith.constant 1.000000e+00 : f32
    %185 = vector.broadcast %cst_52 : f32 to vector<8x128xf32>
    %186 = arith.addf %185, %184 : vector<8x128xf32>
    %187 = arith.divf %185, %186 : vector<8x128xf32>
    %188 = math.tanh %182 : vector<8x128xf32>
    %189 = vector.extract_strided_slice %187 {offsets = [0, 0], sizes = [8, 32], strides = [1, 1]} : vector<8x128xf32> to vector<8x32xf32>
    %190 = vector.extract_strided_slice %187 {offsets = [0, 32], sizes = [8, 32], strides = [1, 1]} : vector<8x128xf32> to vector<8x32xf32>
    %191 = vector.extract_strided_slice %187 {offsets = [0, 64], sizes = [8, 32], strides = [1, 1]} : vector<8x128xf32> to vector<8x32xf32>
    %192 = vector.extract_strided_slice %188 {offsets = [0, 96], sizes = [8, 32], strides = [1, 1]} : vector<8x128xf32> to vector<8x32xf32>
    %193 = arith.mulf %190, %172 : vector<8x32xf32>
    %194 = arith.mulf %189, %192 : vector<8x32xf32>
    %195 = arith.addf %193, %194 : vector<8x32xf32>
    %196 = math.tanh %195 : vector<8x32xf32>
    %197 = arith.mulf %191, %196 : vector<8x32xf32>
    %198 = arith.index_cast %178 : i32 to index
    %c0_53 = arith.constant 0 : index
    %199 = vector.load %arg12[%198, %c0_53] : memref<64x32xf32, #tpu.memory_space<vmem>>, vector<8x32xf32>
    tpu.vector_store %arg12[%198, %c0_53], %197 {strides = array<i32>} : memref<64x32xf32, #tpu.memory_space<vmem>>, vector<8x32xf32>,
    %c8_i32_54 = arith.constant 8 : i32
    %c0_55 = arith.constant 0 : index
    %c0_56 = arith.constant 0 : index
    %200 = vector.load %arg9[%c0_55, %c0_56] : memref<8x32xf32, #tpu.memory_space<vmem>>, vector<8x32xf32>
    tpu.vector_store %arg9[%c0_55, %c0_56], %197 {strides = array<i32>} : memref<8x32xf32, #tpu.memory_space<vmem>>, vector<8x32xf32>,
    %c0_57 = arith.constant 0 : index
    %c0_58 = arith.constant 0 : index
    %201 = vector.load %arg10[%c0_57, %c0_58] : memref<8x32xf32, #tpu.memory_space<vmem>>, vector<8x32xf32>
    tpu.vector_store %arg10[%c0_57, %c0_58], %195 {strides = array<i32>} : memref<8x32xf32, #tpu.memory_space<vmem>>, vector<8x32xf32>,
    %c0_59 = arith.constant 0 : index
    %c0_60 = arith.constant 0 : index
    %202 = vector.load %arg12[%c0_59, %c0_60] : memref<64x32xf32, #tpu.memory_space<vmem>>, vector<64x32xf32>
    %c0_61 = arith.constant 0 : index
    %c0_62 = arith.constant 0 : index
    %203 = vector.load %arg4[%c0_61, %c0_62] : memref<32x128xf32, #tpu.memory_space<vmem>>, vector<32x128xf32>
    %cst_63 = arith.constant dense<0.000000e+00> : vector<64x128xf32>
    %204 = tpu.matmul %202, %203, %cst_63 {dimension_numbers = #tpu.dot_dimension_numbers<[1], [0], [0], [1], [0, 0, 1, 1], [], []>} : vector<64x32xf32>, vector<32x128xf32>, vector<64x128xf32> -> vector<64x128xf32>
    %c0_64 = arith.constant 0 : index
    %c0_65 = arith.constant 0 : index
    %205 = vector.load %arg5[%c0_64, %c0_65] : memref<1x128xf32, #tpu.memory_space<vmem>>, vector<1x128xf32>
    %206 = vector.broadcast %205 : vector<1x128xf32> to vector<64x128xf32>
    %207 = arith.addf %204, %206 : vector<64x128xf32>
    %c0_66 = arith.constant 0 : index
    %c0_67 = arith.constant 0 : index
    %208 = vector.load %arg8[%c0_66, %c0_67] : memref<64x128xf32, #tpu.memory_space<vmem>>, vector<64x128xf32>
    tpu.vector_store %arg8[%c0_66, %c0_67], %207 {strides = array<i32>} : memref<64x128xf32, #tpu.memory_space<vmem>>, vector<64x128xf32>,
    return
  }
}

</mosaic_0001>

<bundles_post_ra>
// kernel: tpu_custom_call.1
= control target key start
LH: loop header
LB: loop body
LE: loop exit
PB: predicated region body
PF: predicated region fallthrough
CT: control target
= control target key end

     0   :  { %16 = vsyncpa [#allocation5], 0  ;;  %s2159_s0 = inlined_call_operand.vmem [shape: s32[64,1], index: 0, kind: input, shape index: {}]   ;;  %s2160_s1 = inlined_call_operand.hbm [shape: f32[16,128], index: 1, kind: input, shape index: {}]   ;;  %s2161_s2 = inlined_call_operand.hbm [shape: f32[1,128], index: 2, kind: input, shape index: {}]   ;;  %s2162_s3 = inlined_call_operand.vmem [shape: f32[32,128], index: 3, kind: input, shape index: {}]   ;;  %s2163_s4 = inlined_call_operand.vmem [shape: f32[32,128], index: 4, kind: input, shape index: {}]   ;;  %s2164_s5 = inlined_call_operand.vmem [shape: f32[1,128], index: 5, kind: input, shape index: {}]   ;;  %s2165_s6 = inlined_call_operand.vmem [shape: f32[8,32], index: 6, kind: input, shape index: {}]   ;;  %s2166_s7 = inlined_call_operand.vmem [shape: f32[8,32], index: 7, kind: input, shape index: {}]   ;;  %s2167_s8 = inlined_call_operand.hbm [shape: f32[64,128], index: 8, kind: output, shape index: {0}]   ;;  %s2168_s9 = inlined_call_operand.hbm [shape: f32[8,32], index: 9, kind: output, shape index: {1}]   ;;  %s2169_s10 = inlined_call_operand.hbm [shape: f32[8,32], index: 10, kind: output, shape index: {2}]  }
   0x1   :  { %17 = vsyncpa [#allocation8], 0 }
   0x2   :  { %18 = vsyncpa [#allocation6], 0 }
   0x3   :  { %19 = vsyncpa [#allocation11], 0  ;;  %s1794_s13 = smov [#allocation4]   ;;  %s1676_s17 = scalar_lea.hbm %s2160_s1, 256 }
   0x4   :  { %s27_s14 = sshll.u32 %s1794_s13, 4  ;;  %p1677_p0 = scmp.ne.s32.totalorder %s2160_s1, %s1676_s17  ;;  %s28_s14 = int_to_ptr.vmem [resolvable:$true] %s27_s14 }
   0x5   :  { %p1680_p1 = scmp.lt.u32.totalorder %s1676_s17, %s2160_s1 }
   0x7   :  { %p1682_p2 = pnand %p1680_p1, %p1677_p0 }
   0x9   :  { %1685 = shalt.err (!%p1682_p2)
}
   0xa   :  { %s1686_s22 = scalar_lea.vmem %s28_s14, 256  ;;  %p1691_p4 = scmp.lt.s32.totalorder %s28_s14, %s28_s14 }
   0xb   :  { %p1687_p3 = scmp.ne.s32.totalorder %s28_s14, %s1686_s22  ;;  %p1692_p5 = scmp.lt.s32.totalorder %s1686_s22, %s1686_s22 }
   0xd   :  { %p1693_p6 = por %p1692_p5, %p1691_p4 }
   0xf   :  { %p1694_p7 = pnand %p1693_p6, %p1687_p3 }
  0x11   :  { %1697 = shalt.err (!%p1694_p7)
}
  0x12   :  { %s1795_s23 = smov 128   ;;  %s1796_s24 = smov 8  }
  0x13   :  { %33 = dma.hbm_to_vmem [thread:$0]  %s2160_s1, 256, %s28_s14, [#allocation5], %s1795_s23, %s1795_s23, %s1796_s24  }
  0x14   :  { %s1797_s27 = smov [#allocation7]   ;;  %s1698_s11 = scalar_lea.hbm %s2161_s2, 16 }
  0x15   :  { %s40_s28 = sshll.u32 %s1797_s27, 4  ;;  %p1699_p8 = scmp.ne.s32.totalorder %s2161_s2, %s1698_s11  ;;  %s41_s28 = int_to_ptr.vmem [resolvable:$true] %s40_s28 }
  0x16   :  { %p1702_p9 = scmp.lt.u32.totalorder %s1698_s11, %s2161_s2 }
  0x18   :  { %p1704_p10 = pnand %p1702_p9, %p1699_p8 }
  0x1a   :  { %1707 = shalt.err (!%p1704_p10)
}
  0x1b   :  { %s1708_s17 = scalar_lea.vmem %s41_s28, 16  ;;  %s1712_s1 = scalar_lea.vmem %s41_s28, 32 }
  0x1c   :  { %p1709_p11 = scmp.ne.s32.totalorder %s41_s28, %s1708_s17  ;;  %p1713_p12 = scmp.lt.s32.totalorder %s41_s28, %s41_s28 }
  0x1d   :  { %p1714_p13 = scmp.lt.s32.totalorder %s1712_s1, %s1708_s17 }
  0x1f   :  { %p1715_p0 = por %p1714_p13, %p1713_p12 }
  0x21   :  { %p1716_p1 = pnand %p1715_p0, %p1709_p11 }
  0x23   :  { %1719 = shalt.err (!%p1716_p1)
}
  0x24   :  { %43 = dma.hbm_to_vmem [thread:$0]  %s2161_s2, 16, %s41_s28, [#allocation8]  }
  0x25   :  { %1786 = dma.done.wait [#allocation5], 256  }
  0x26   :  { %1787 = vsyncadd [#allocation5], 4294967040 }
  0x27   :  { %1788 = dma.done.wait [#allocation8], 16  }
  0x28   :  { %1789 = vsyncadd [#allocation8], 4294967280  ;;  %v1798_v0 = vmov 0   ;;  %v66_v1 = vld [vmem:[%s2159_s0 + $0x30] sm:$0xff]  ;;  %v64_v2 = vld [vmem:[%s2159_s0 + $0x20] sm:$0xff]  ;;  %v1799_v10 = vmov 0.0|0.0   ;;  %v68_v12 = vlaneseq }
  0x29   :  { %1611 = vset.pattern.permute.xlu1 %v1798_v0  ;;  %1610 = vset.pattern.permute.xlu0 %v1798_v0  ;;  %v65_v3 = vld [vmem:[%s2159_s0 + $0x28] sm:$0xff]  ;;  %v60_v4 = vld [vmem:[%s2159_s0] sm:$0xff]  ;;  %v110_v5 = vld [vmem:[#allocation4] sm:$0xff]  ;;  %s1800_s15 = smov 32   ;;  %vm119_vm0 = vcmask 130048   ;;  %v1801_v18 = vmov 0.0  }
  0x2a   :  { %89 = vperm.xlu1 %1611, %v66_v1   ;;  %83 = vperm.xlu0 %1610, %v64_v2   ;;  %v111_v6 = vld [vmem:[#allocation4 + $0x8] sm:$0xff]  ;;  %v61_v9 = vld [vmem:[%s2159_s0 + $0x8] sm:$0xff]  ;;  %v262_v11 = vld [vmem:[%s2166_s7] sm:$0xff]  ;;  %v1914_v13 = vand.u32 127, %v68_v12  ;;  %vm1802_vm7 = vmmov 0   ;;  %vm264_vm8 = vcmask 261120  }
  0x2b   :  { %v1534_v7 = vpack.c.bf16 %v111_v6, %v110_v5  ;;  %v67_v8 = vld [vmem:[%s2159_s0 + $0x38] sm:$0xff]  ;;  %v257_v16 = vld [vmem:[%s2162_s3] sm:$0xff]  ;;  %v258_v17 = vld [vmem:[%s2162_s3 + $0x8] sm:$0xff]  ;;  %s1805_s17 = smov [#allocation10]  }
  0x2c   :  { %v1926_v22 = vpack.c.bf16 %v258_v17, %v257_v16  ;;  %v259_v23 = vld [vmem:[%s2162_s3 + $0x10] sm:$0xff]  ;;  %v260_v24 = vld [vmem:[%s2162_s3 + $0x18] sm:$0xff]  ;;  %v261_v33 = vld [vmem:[%s2165_s6] sm:$0xff]  ;;  %s1803_s6 = smov 64   ;;  %s1287_s1 = sshll.u32 %s1805_s17, 4  ;;  %s1288_s1 = int_to_ptr.vmem [resolvable:$true] %s1287_s1 }
  0x2d   :  { %1594 = vmatprep.subr.bf16.mxu1 %v1534_v7  ;;  %1535 = vmatprep.subr.bf16.mxu0 %v1534_v7  ;;  %v1943_v30 = vpack.c.bf16 %v260_v24, %v259_v23  ;;  %v1976_v38 = vld [vmem:[#allocation7] ss:$0 sm:$0xff]  ;;  %p1725_p3 = scmp.lt.s32.totalorder %s1288_s1, %s1288_s1 }
  0x2e   :  { %86 = vperm.xlu0 %1610, %v65_v3   ;;  %71 = vperm.xlu1 %1611, %v60_v4  }
  0x2f   :  { %1595 = vmatpush3.bf16.msra.mxu1 %v1534_v7  ;;  %1537 = vmatpush3.bf16.msra.mxu0 %v1534_v7  ;;  %v62_v7 = vld [vmem:[%s2159_s0 + $0x10] sm:$0xff] }
  0x30   :  { %1538 = vmatprep.subr.bf16.mxu1 %v1799_v10  ;;  %1550 = vmatprep.subr.bf16.mxu0 %v1799_v10 }
  0x32   :  { %92 = vperm.xlu0 %1610, %v67_v8   ;;  %74 = vperm.xlu1 %1611, %v61_v9  }
  0x36   :  { %347 = vrot.lane.b32.xlu1 %v262_v11, %s1800_s15 }
  0xa9   :  { %v90_v14 = vpop.permute.xlu1 %89  ;;  %v84_v15 = vpop.permute.xlu0 %83 }
  0xaa   :  { %vm98_vm1 = vcmp.eq.s32.totalorder %v84_v15, %v1914_v13  ;;  %vm100_vm2 = vcmp.eq.s32.totalorder %v90_v14, %v1914_v13  ;;  %v63_v14 = vld [vmem:[%s2159_s0 + $0x18] sm:$0xff] }
  0xab   :  { %v106_v19 = vsel %vm98_vm1, 1.0, %v1801_v18  ;;  %v108_v27 = vsel %vm100_vm2, 1.0, %v1801_v18 }
  0xac   :  { %1420 = vmatprep.mubr.msk.f32.mxu1 %vm119_vm0, %v106_v19 }
  0xad   :  { %v87_v20 = vpop.permute.xlu0 %86  ;;  %v72_v21 = vpop.permute.xlu1 %71 }
  0xae   :  { %vm99_vm3 = vcmp.eq.s32.totalorder %v87_v20, %v1914_v13  ;;  %vm94_vm4 = vcmp.eq.s32.totalorder %v72_v21, %v1914_v13 }
  0xaf   :  { %v107_v25 = vsel %vm99_vm3, 1.0, %v1801_v18  ;;  %v102_v26 = vsel %vm94_vm4, 1.0, %v1801_v18 }
  0xb0   :  { %1414 = vmatprep.mubr.msk.f32.mxu0 %vm119_vm0, %v102_v26  ;;  %1421 = vmatmul.mubr.msk.f32.vlgmr.msra.gmra.mrb[0].mxu1 %vm119_vm0, %v107_v25 }
  0xb1   :  { %1540 = vmatpush3.bf16.msra.mxu1 %v1926_v22  ;;  %1423 = vmatprep.mubr.msk.f32.mxu1 %vm119_vm0, %v108_v27  ;;  %v93_v28 = vpop.permute.xlu0 %92  ;;  %v75_v29 = vpop.permute.xlu1 %74 }
  0xb2   :  { %vm101_vm5 = vcmp.eq.s32.totalorder %v93_v28, %v1914_v13  ;;  %vm95_vm6 = vcmp.eq.s32.totalorder %v75_v29, %v1914_v13  ;;  %1541 = vmatprep.subr.bf16.mxu1 %v1799_v10 }
  0xb3   :  { %v109_v31 = vsel %vm101_vm5, 1.0, %v1801_v18  ;;  %v103_v32 = vsel %vm95_vm6, 1.0, %v1801_v18 }
  0xb4   :  { %1415 = vmatmul.mubr.msk.f32.vlgmr.msra.gmra.mrb[0].mxu0 %vm119_vm0, %v103_v32  ;;  %1424 = vmatmul.mubr.msk.f32.gmra.mrb[2].mxu1 %vm119_vm0, %v109_v31 }
  0xb5   :  { %1543 = vmatpush3.bf16.msra.mxu1 %v1943_v30  ;;  %1434 = vmatprep.mubr.msk.f32.mxu1 %vm1802_vm7, %v1801_v18  ;;  %v348_v52 = vpop.permute.xlu1 %347 }
  0xb6   :  { %1544 = vmatprep.subr.bf16.mxu1 %v1799_v10  ;;  %1552 = vmatpush3.bf16.msra.mxu0 %v1926_v22 }
  0xb7   :  { %1553 = vmatprep.subr.bf16.mxu0 %v1799_v10 }
  0xb8   :  { %1435 = vmatmul.mubr.msk.f32.vlgmr.msra.gmra.mrb[4].mxu1 %vm264_vm8, %v261_v33 }
  0xb9   :  { %1546 = vmatpush3.bf16.msra.mxu1 %v1926_v22  ;;  %1445 = vmatprep.mubr.msk.f32.mxu1 %vm1802_vm7, %v1801_v18 }
  0xba   :  { %1547 = vmatprep.subr.bf16.mxu1 %v1799_v10  ;;  %1555 = vmatpush3.bf16.msra.mxu0 %v1943_v30 }
  0xbb   :  { %1562 = vmatprep.subr.bf16.mxu0 %v1799_v10 }
  0xbd   :  { %1549 = vmatpush3.bf16.msra.mxu1 %v1943_v30 }
  0xbe   :  { %1556 = vmatprep.subr.bf16.mxu1 %v1799_v10 }
 0x183   :  { %v1970_v34 = vpop.f32.mrb[0].mxu1 }
 0x184   :  { %v1972_v35 = vpop.f32.mrb[1].mxu1 }
 0x187   :  { %v1416_v36 = vpop.f32.mrb[0].mxu0  ;;  %v1974_v37 = vpop.f32.mrb[2].mxu1 }
 0x188   :  { %v210_v39 = vpop.f32.mrb[1].mxu0  ;;  %v1978_v40 = vpop.f32.mrb[3].mxu1  ;;  %v216_v60 = vadd.f32 %v1416_v36, %v1976_v38 }
 0x189   :  { %v211_v41 = vadd.f32 %v1976_v38, %v210_v39 }
 0x18b   :  { %v334_v42 = vpop.f32.mrb[4].mxu1 }
 0x18c   :  { %v338_v43 = vadd.f32 %v334_v42, %v211_v41  ;;  %v1436_v44 = vpop.f32.mrb[5].mxu1 }
 0x18e   :  { %1612 = vtanh.f32 %v338_v43  ;;  %v1324_v46 = vmul.f32 -1.442695, %v338_v43 }
 0x190   :  { %1614 = vpow2.f32 %v1324_v46 }
 0x198   :  { %v1613_v45 = vpop.eup %1612 }
 0x199   :  { %352 = vrot.lane.b32.xlu0 %v1613_v45, %s1800_s15 }
 0x19a   :  { %v1615_v47 = vpop.eup %1614 }
 0x19b   :  { %v342_v48 = vadd.f32 1.0, %v1615_v47 }
 0x19d   :  { %1616 = vrcp.f32 %v342_v48 }
 0x1a7   :  { %v1617_v49 = vpop.eup %1616 }
 0x1a8   :  { %v350_v53 = vmul.f32 %v1617_v49, %v348_v52 }
 0x20b   :  { %v353_v50 = vpop.permute.xlu0 %352 }
 0x20c   :  { %v355_v51 = vmul.f32 %v1617_v49, %v353_v50 }
 0x20e   :  { %357 = vrot.lane.b32.xlu0 %v355_v51, %s1800_s15 }
 0x280   :  { %v358_v54 = vpop.permute.xlu0 %357 }
 0x281   :  { %v360_v55 = vadd.f32 %v358_v54, %v350_v53 }
 0x283   :  { %1618 = vtanh.f32 %v360_v55 }
 0x28d   :  { %v1619_v56 = vpop.eup %1618 }
 0x28e   :  { %363 = vrot.lane.b32.xlu1 %v1619_v56, %s1800_s15 }
 0x300   :  { %v364_v57 = vpop.permute.xlu1 %363 }
 0x301   :  { %v366_v58 = vmul.f32 %v1617_v49, %v364_v57 }
 0x303   :  { %368 = vrot.lane.b32.xlu0 %v366_v58, %s1803_s6 }
 0x375   :  { %v369_v59 = vpop.permute.xlu0 %368 }
 0x376   :  { %371 = vst.msk [vmem:[#allocation3] sm:$0xff] %vm264_vm8, %v369_v59  ;;  %1446 = vmatmul.mubr.msk.f32.vlgmr.msra.gmra.mrb[6].mxu1 %vm264_vm8, %v369_v59 }
 0x377   :  { %1558 = vmatpush3.bf16.msra.mxu1 %v1926_v22  ;;  %1467 = vmatprep.mubr.msk.f32.mxu1 %vm1802_vm7, %v1801_v18 }
 0x378   :  { %1559 = vmatprep.subr.bf16.mxu1 %v1799_v10 }
 0x37b   :  { %1561 = vmatpush3.bf16.msra.mxu1 %v1943_v30 }
 0x37c   :  { %1568 = vmatprep.subr.bf16.mxu1 %v1799_v10 }
 0x449   :  { %v442_v61 = vpop.f32.mrb[6].mxu1 }
 0x44a   :  { %v446_v62 = vadd.f32 %v442_v61, %v216_v60  ;;  %v1447_v63 = vpop.f32.mrb[7].mxu1 }
 0x44c   :  { %1620 = vtanh.f32 %v446_v62  ;;  %v1326_v1 = vmul.f32 -1.442695, %v446_v62 }
 0x44e   :  { %1622 = vpow2.f32 %v1326_v1 }
 0x456   :  { %v1621_v0 = vpop.eup %1620 }
 0x457   :  { %456 = vrot.lane.b32.xlu1 %v1621_v0, %s1800_s15 }
 0x458   :  { %v1623_v2 = vpop.eup %1622 }
 0x459   :  { %v450_v3 = vadd.f32 1.0, %v1623_v2 }
 0x45b   :  { %1624 = vrcp.f32 %v450_v3  ;;  %v231_v3 = vadd.f32 %v1976_v38, %v1972_v35 }
 0x465   :  { %v1625_v4 = vpop.eup %1624 }
 0x466   :  { %v454_v8 = vmul.f32 %v1625_v4, %v360_v55 }
 0x4c9   :  { %v457_v5 = vpop.permute.xlu1 %456 }
 0x4ca   :  { %v459_v6 = vmul.f32 %v1625_v4, %v457_v5 }
 0x4cc   :  { %461 = vrot.lane.b32.xlu0 %v459_v6, %s1800_s15 }
 0x4d0   :  { %77 = vperm.xlu0 %1610, %v62_v7  }
 0x53e   :  { %v462_v9 = vpop.permute.xlu0 %461 }
 0x53f   :  { %v464_v11 = vadd.f32 %v462_v9, %v454_v8 }
 0x541   :  { %1626 = vtanh.f32 %v464_v11 }
 0x54b   :  { %v1627_v12 = vpop.eup %1626 }
 0x54c   :  { %467 = vrot.lane.b32.xlu1 %v1627_v12, %s1800_s15 }
 0x54f   :  { %v78_v15 = vpop.permute.xlu0 %77 }
 0x550   :  { %vm96_vm9 = vcmp.eq.s32.totalorder %v78_v15, %v1914_v13  ;;  %80 = vperm.xlu1 %1611, %v63_v14  }
 0x551   :  { %v104_v16 = vsel %vm96_vm9, 1.0, %v1801_v18 }
 0x552   :  { %1417 = vmatprep.mubr.msk.f32.mxu0 %vm119_vm0, %v104_v16 }
 0x5be   :  { %v468_v17 = vpop.permute.xlu1 %467 }
 0x5bf   :  { %v470_v19 = vmul.f32 %v1625_v4, %v468_v17 }
 0x5c1   :  { %472 = vrot.lane.b32.xlu0 %v470_v19, %s1803_s6 }
 0x5cf   :  { %v81_v20 = vpop.permute.xlu1 %80 }
 0x5d0   :  { %vm97_vm10 = vcmp.eq.s32.totalorder %v81_v20, %v1914_v13 }
 0x5d1   :  { %v105_v21 = vsel %vm97_vm10, 1.0, %v1801_v18 }
 0x5d2   :  { %1418 = vmatmul.mubr.msk.f32.gmra.mrb[2].mxu0 %vm119_vm0, %v105_v21 }
 0x5d3   :  { %1456 = vmatprep.mubr.msk.f32.mxu0 %vm1802_vm7, %v1801_v18 }
 0x633   :  { %v473_v23 = vpop.permute.xlu0 %472 }
 0x634   :  { %476 = vst.msk [vmem:[#allocation3 + $0x8] sm:$0xff] %vm264_vm8, %v473_v23  ;;  %1457 = vmatmul.mubr.msk.f32.vlgmr.msra.gmra.mrb[4].mxu0 %vm264_vm8, %v473_v23 }
 0x635   :  { %1564 = vmatpush3.bf16.msra.mxu0 %v1926_v22  ;;  %1478 = vmatprep.mubr.msk.f32.mxu0 %vm1802_vm7, %v1801_v18 }
 0x636   :  { %1565 = vmatprep.subr.bf16.mxu0 %v1799_v10 }
 0x639   :  { %1567 = vmatpush3.bf16.msra.mxu0 %v1943_v30 }
 0x63a   :  { %1574 = vmatprep.subr.bf16.mxu0 %v1799_v10 }
 0x6a5   :  { %v1419_v13 = vpop.f32.mrb[2].mxu0 }
 0x6a6   :  { %v220_v24 = vpop.f32.mrb[3].mxu0  ;;  %v226_v49 = vadd.f32 %v1419_v13, %v1976_v38  ;;  %v236_v13 = vadd.f32 %v1970_v34, %v1976_v38 }
 0x6a7   :  { %v221_v25 = vadd.f32 %v1976_v38, %v220_v24 }
 0x707   :  { %v547_v26 = vpop.f32.mrb[4].mxu0 }
 0x708   :  { %v551_v27 = vadd.f32 %v547_v26, %v221_v25  ;;  %v1458_v28 = vpop.f32.mrb[5].mxu0 }
 0x70a   :  { %1628 = vtanh.f32 %v551_v27  ;;  %v1328_v31 = vmul.f32 -1.442695, %v551_v27 }
 0x70c   :  { %1630 = vpow2.f32 %v1328_v31 }
 0x714   :  { %v1629_v29 = vpop.eup %1628 }
 0x715   :  { %561 = vrot.lane.b32.xlu1 %v1629_v29, %s1800_s15 }
 0x716   :  { %v1631_v32 = vpop.eup %1630 }
 0x717   :  { %v555_v33 = vadd.f32 1.0, %v1631_v32 }
 0x719   :  { %1632 = vrcp.f32 %v555_v33  ;;  %v1121_v33 = vld [vmem:[%s2163_s4] sm:$0xff] }
 0x723   :  { %v1633_v36 = vpop.eup %1632 }
 0x724   :  { %v559_v42 = vmul.f32 %v1633_v36, %v464_v11 }
 0x787   :  { %v562_v39 = vpop.permute.xlu1 %561 }
 0x788   :  { %v564_v41 = vmul.f32 %v1633_v36, %v562_v39 }
 0x78a   :  { %566 = vrot.lane.b32.xlu0 %v564_v41, %s1800_s15 }
 0x7fc   :  { %v567_v43 = vpop.permute.xlu0 %566 }
 0x7fd   :  { %v569_v44 = vadd.f32 %v567_v43, %v559_v42 }
 0x7ff   :  { %1634 = vtanh.f32 %v569_v44 }
 0x809   :  { %v1635_v45 = vpop.eup %1634 }
 0x80a   :  { %572 = vrot.lane.b32.xlu1 %v1635_v45, %s1800_s15  ;;  %v1124_v45 = vld [vmem:[%s2163_s4 + $0x18] sm:$0xff] }
 0x87c   :  { %v573_v46 = vpop.permute.xlu1 %572 }
 0x87d   :  { %v575_v47 = vmul.f32 %v1633_v36, %v573_v46  ;;  %v1122_v36 = vld [vmem:[%s2163_s4 + $0x8] sm:$0xff] }
 0x87e   :  { %v1586_v39 = vpack.c.bf16 %v1122_v36, %v1121_v33 }
 0x87f   :  { %577 = vrot.lane.b32.xlu0 %v575_v47, %s1803_s6 }
 0x8f1   :  { %v578_v48 = vpop.permute.xlu0 %577 }
 0x8f2   :  { %581 = vst.msk [vmem:[#allocation3 + $0x10] sm:$0xff] %vm264_vm8, %v578_v48  ;;  %1468 = vmatmul.mubr.msk.f32.vlgmr.msra.gmra.mrb[8].mxu1 %vm264_vm8, %v578_v48  ;;  %v1113_v48 = vld [vmem:[#allocation3] sm:$0xff] }
 0x8f3   :  { %1570 = vmatpush3.bf16.msra.mxu1 %v1926_v22  ;;  %1489 = vmatprep.mubr.msk.f32.mxu1 %vm1802_vm7, %v1801_v18 }
 0x8f4   :  { %1571 = vmatprep.subr.bf16.mxu1 %v1799_v10 }
 0x8f7   :  { %1573 = vmatpush3.bf16.msra.mxu1 %v1943_v30 }
 0x8f8   :  { %1580 = vmatprep.subr.bf16.mxu1 %v1799_v10 }
 0x9c5   :  { %v652_v50 = vpop.f32.mrb[8].mxu1 }
 0x9c6   :  { %v656_v51 = vadd.f32 %v652_v50, %v226_v49  ;;  %v1469_v52 = vpop.f32.mrb[9].mxu1  ;;  %v1114_v49 = vld [vmem:[#allocation3 + $0x8] sm:$0xff]  ;;  %v1115_v50 = vld [vmem:[#allocation3 + $0x10] sm:$0xff] }
 0x9c8   :  { %1636 = vtanh.f32 %v656_v51  ;;  %v1330_v54 = vmul.f32 -1.442695, %v656_v51 }
 0x9ca   :  { %1638 = vpow2.f32 %v1330_v54  ;;  %v241_v54 = vadd.f32 %v1976_v38, %v1978_v40 }
 0x9d2   :  { %v1637_v53 = vpop.eup %1636 }
 0x9d3   :  { %666 = vrot.lane.b32.xlu1 %v1637_v53, %s1800_s15 }
 0x9d4   :  { %v1639_v55 = vpop.eup %1638 }
 0x9d5   :  { %v660_v56 = vadd.f32 1.0, %v1639_v55 }
 0x9d7   :  { %1640 = vrcp.f32 %v660_v56 }
 0x9e1   :  { %v1641_v57 = vpop.eup %1640 }
 0x9e2   :  { %v664_v60 = vmul.f32 %v1641_v57, %v569_v44  ;;  %v1123_v44 = vld [vmem:[%s2163_s4 + $0x10] sm:$0xff] }
 0x9e3   :  { %v1590_v46 = vpack.c.bf16 %v1124_v45, %v1123_v44 }
 0xa45   :  { %v667_v58 = vpop.permute.xlu1 %666 }
 0xa46   :  { %v669_v59 = vmul.f32 %v1641_v57, %v667_v58  ;;  %v2092_v58 = vld [vmem:[%s2164_s5] ss:$0 sm:$0xff]  ;;  %s1804_s5 = smov 96  }
 0xa48   :  { %671 = vrot.lane.b32.xlu0 %v669_v59, %s1800_s15 }
 0xaba   :  { %v672_v61 = vpop.permute.xlu0 %671 }
 0xabb   :  { %v674_v62 = vadd.f32 %v672_v61, %v664_v60 }
 0xabd   :  { %1642 = vtanh.f32 %v674_v62 }
 0xac7   :  { %v1643_v63 = vpop.eup %1642 }
 0xac8   :  { %677 = vrot.lane.b32.xlu1 %v1643_v63, %s1800_s15 }
 0xb3a   :  { %v678_v0 = vpop.permute.xlu1 %677 }
 0xb3b   :  { %v680_v1 = vmul.f32 %v1641_v57, %v678_v0 }
 0xb3d   :  { %682 = vrot.lane.b32.xlu0 %v680_v1, %s1803_s6 }
 0xbaf   :  { %v683_v2 = vpop.permute.xlu0 %682 }
 0xbb0   :  { %686 = vst.msk [vmem:[#allocation3 + $0x18] sm:$0xff] %vm264_vm8, %v683_v2  ;;  %1479 = vmatmul.mubr.msk.f32.vlgmr.msra.gmra.mrb[6].mxu0 %vm264_vm8, %v683_v2 }
 0xbb1   :  { %1576 = vmatpush3.bf16.msra.mxu0 %v1926_v22  ;;  %1500 = vmatprep.mubr.msk.f32.mxu0 %vm1802_vm7, %v1801_v18 }
 0xbb2   :  { %1577 = vmatprep.subr.bf16.mxu0 %v1799_v10 }
 0xbb5   :  { %1579 = vmatpush3.bf16.msra.mxu0 %v1943_v30 }
 0xbb6   :  { %1587 = vmatprep.subr.bf16.mxu0 %v1586_v39 }
 0xbb7   :  { %v1116_v51 = vld [vmem:[#allocation3 + $0x18] sm:$0xff] }
 0xc83   :  { %v757_v4 = vpop.f32.mrb[6].mxu0 }
 0xc84   :  { %v761_v5 = vadd.f32 %v757_v4, %v231_v3  ;;  %v1480_v6 = vpop.f32.mrb[7].mxu0 }
 0xc86   :  { %1644 = vtanh.f32 %v761_v5  ;;  %v1332_v8 = vmul.f32 -1.442695, %v761_v5 }
 0xc88   :  { %1646 = vpow2.f32 %v1332_v8 }
 0xc90   :  { %v1645_v7 = vpop.eup %1644 }
 0xc91   :  { %771 = vrot.lane.b32.xlu1 %v1645_v7, %s1800_s15 }
 0xc92   :  { %v1647_v9 = vpop.eup %1646 }
 0xc93   :  { %v765_v11 = vadd.f32 1.0, %v1647_v9 }
 0xc95   :  { %1648 = vrcp.f32 %v765_v11 }
 0xc9f   :  { %v1649_v12 = vpop.eup %1648 }
 0xca0   :  { %v769_v16 = vmul.f32 %v1649_v12, %v674_v62 }
 0xd03   :  { %v772_v14 = vpop.permute.xlu1 %771 }
 0xd04   :  { %v774_v15 = vmul.f32 %v1649_v12, %v772_v14 }
 0xd06   :  { %776 = vrot.lane.b32.xlu0 %v774_v15, %s1800_s15 }
 0xd78   :  { %v777_v17 = vpop.permute.xlu0 %776 }
 0xd79   :  { %v779_v35 = vadd.f32 %v777_v17, %v769_v16 }
 0xd7b   :  { %1650 = vtanh.f32 %v779_v35 }
 0xd85   :  { %v1651_v19 = vpop.eup %1650 }
 0xd86   :  { %782 = vrot.lane.b32.xlu1 %v1651_v19, %s1800_s15 }
 0xdf8   :  { %v783_v20 = vpop.permute.xlu1 %782 }
 0xdf9   :  { %v785_v21 = vmul.f32 %v1649_v12, %v783_v20 }
 0xdfb   :  { %787 = vrot.lane.b32.xlu0 %v785_v21, %s1803_s6 }
 0xe6d   :  { %v788_v23 = vpop.permute.xlu0 %787 }
 0xe6e   :  { %791 = vst.msk [vmem:[#allocation3 + $0x20] sm:$0xff] %vm264_vm8, %v788_v23  ;;  %1490 = vmatmul.mubr.msk.f32.vlgmr.msra.gmra.mrb[10].mxu1 %vm264_vm8, %v788_v23 }
 0xe6f   :  { %1582 = vmatpush3.bf16.msra.mxu1 %v1926_v22  ;;  %1511 = vmatprep.mubr.msk.f32.mxu1 %vm1802_vm7, %v1801_v18 }
 0xe70   :  { %1583 = vmatprep.subr.bf16.mxu1 %v1799_v10 }
 0xe73   :  { %1585 = vmatpush3.bf16.msra.mxu1 %v1943_v30 }
 0xe75   :  { %v1117_v52 = vld [vmem:[#allocation3 + $0x20] sm:$0xff] }
 0xf41   :  { %v862_v24 = vpop.f32.mrb[10].mxu1 }
 0xf42   :  { %v866_v25 = vadd.f32 %v862_v24, %v236_v13  ;;  %v1491_v26 = vpop.f32.mrb[11].mxu1  ;;  %v246_v13 = vadd.f32 %v1974_v37, %v1976_v38 }
 0xf44   :  { %1652 = vtanh.f32 %v866_v25  ;;  %v1334_v28 = vmul.f32 -1.442695, %v866_v25 }
 0xf46   :  { %1654 = vpow2.f32 %v1334_v28 }
 0xf4e   :  { %v1653_v27 = vpop.eup %1652 }
 0xf4f   :  { %876 = vrot.lane.b32.xlu1 %v1653_v27, %s1800_s15 }
 0xf50   :  { %v1655_v22 = vpop.eup %1654 }
 0xf51   :  { %v870_v29 = vadd.f32 1.0, %v1655_v22 }
 0xf53   :  { %1656 = vrcp.f32 %v870_v29 }
 0xf5d   :  { %v1657_v18 = vpop.eup %1656 }
 0xf5e   :  { %v874_v30 = vmul.f32 %v1657_v18, %v779_v35 }
 0xfc1   :  { %v877_v31 = vpop.permute.xlu1 %876 }
 0xfc2   :  { %v879_v10 = vmul.f32 %v1657_v18, %v877_v31 }
 0xfc4   :  { %881 = vrot.lane.b32.xlu0 %v879_v10, %s1800_s15 }
0x1036   :  { %v882_v32 = vpop.permute.xlu0 %881 }
0x1037   :  { %v2062_v34 = vadd.f32 %v882_v32, %v874_v30 }
0x1039   :  { %1658 = vtanh.f32 %v2062_v34 }
0x1043   :  { %v1659_v41 = vpop.eup %1658 }
0x1044   :  { %887 = vrot.lane.b32.xlu1 %v1659_v41, %s1800_s15 }
0x10b6   :  { %v888_v42 = vpop.permute.xlu1 %887 }
0x10b7   :  { %v890_v43 = vmul.f32 %v1657_v18, %v888_v42 }
0x10b9   :  { %892 = vrot.lane.b32.xlu0 %v890_v43, %s1803_s6 }
0x112b   :  { %v893_v47 = vpop.permute.xlu0 %892 }
0x112c   :  { %896 = vst.msk [vmem:[#allocation3 + $0x28] sm:$0xff] %vm264_vm8, %v893_v47  ;;  %1501 = vmatmul.mubr.msk.f32.vlgmr.msra.gmra.mrb[8].mxu0 %vm264_vm8, %v893_v47 }
0x112d   :  { %1589 = vmatpush3.bf16.msra.mxu0 %v1586_v39  ;;  %1522 = vmatprep.mubr.msk.f32.mxu0 %vm264_vm8, %v1113_v48 }
0x112e   :  { %1591 = vmatprep.subr.bf16.mxu0 %v1590_v46 }
0x1131   :  { %1593 = vmatpush3.bf16.msra.mxu0 %v1590_v46 }
0x1133   :  { %v1118_v53 = vld [vmem:[#allocation3 + $0x28] sm:$0xff] }
0x1134   :  { %1523 = vmatmul.mubr.msk.f32.vlgmr.msra.gmra.mrb[10].mxu0 %vm264_vm8, %v1114_v49 }
0x1135   :  { %1525 = vmatprep.mubr.msk.f32.mxu0 %vm264_vm8, %v1115_v50 }
0x1138   :  { %1526 = vmatmul.mubr.msk.f32.gmra.mrb[12].mxu0 %vm264_vm8, %v1116_v51 }
0x1139   :  { %1528 = vmatprep.mubr.msk.f32.mxu0 %vm264_vm8, %v1117_v52 }
0x113c   :  { %1529 = vmatmul.mubr.msk.f32.gmra.mrb[14].mxu0 %vm264_vm8, %v1118_v53 }
0x11ff   :  { %v967_v55 = vpop.f32.mrb[8].mxu0 }
0x1200   :  { %v971_v56 = vadd.f32 %v967_v55, %v241_v54  ;;  %v1502_v57 = vpop.f32.mrb[9].mxu0 }
0x1202   :  { %1660 = vtanh.f32 %v971_v56  ;;  %v1336_v7 = vmul.f32 -1.442695, %v971_v56 }
0x1204   :  { %1662 = vpow2.f32 %v1336_v7 }
0x1207   :  { %v1524_v59 = vpop.f32.mrb[10].mxu0 }
0x1208   :  { %v1228_v60 = vadd.f32 %v1524_v59, %v2092_v58  ;;  %v1222_v61 = vpop.f32.mrb[11].mxu0 }
0x1209   :  { %v1223_v62 = vadd.f32 %v2092_v58, %v1222_v61 }
0x120a   :  { %1262 = vst [vmem:[#allocation9 + $0x8] sm:$0xff] %v1228_v60 }
0x120b   :  { %1261 = vst [vmem:[#allocation9] sm:$0xff] %v1223_v62  ;;  %v1527_v63 = vpop.f32.mrb[12].mxu0 }
0x120c   :  { %v1661_v0 = vpop.eup %1660  ;;  %v1238_v40 = vadd.f32 %v1527_v63, %v2092_v58  ;;  %v1232_v1 = vpop.f32.mrb[13].mxu0 }
0x120d   :  { %v1233_v2 = vadd.f32 %v2092_v58, %v1232_v1  ;;  %981 = vrot.lane.b32.xlu1 %v1661_v0, %s1800_s15 }
0x120e   :  { %1264 = vst [vmem:[#allocation9 + $0x18] sm:$0xff] %v1238_v40  ;;  %v1663_v8 = vpop.eup %1662 }
0x120f   :  { %1263 = vst [vmem:[#allocation9 + $0x10] sm:$0xff] %v1233_v2  ;;  %v1530_v3 = vpop.f32.mrb[14].mxu0  ;;  %v975_v9 = vadd.f32 1.0, %v1663_v8 }
0x1210   :  { %v1248_v4 = vadd.f32 %v1530_v3, %v2092_v58  ;;  %v1242_v5 = vpop.f32.mrb[15].mxu0 }
0x1211   :  { %v1243_v6 = vadd.f32 %v2092_v58, %v1242_v5  ;;  %1664 = vrcp.f32 %v975_v9 }
0x1212   :  { %1266 = vst [vmem:[#allocation9 + $0x28] sm:$0xff] %v1248_v4 }
0x1213   :  { %1265 = vst [vmem:[#allocation9 + $0x20] sm:$0xff] %v1243_v6 }
0x121b   :  { %v1665_v11 = vpop.eup %1664 }
0x121c   :  { %v979_v15 = vmul.f32 %v1665_v11, %v2062_v34 }
0x127f   :  { %v982_v12 = vpop.permute.xlu1 %981 }
0x1280   :  { %v984_v14 = vmul.f32 %v1665_v11, %v982_v12 }
0x1282   :  { %986 = vrot.lane.b32.xlu0 %v984_v14, %s1800_s15 }
0x12f4   :  { %v987_v16 = vpop.permute.xlu0 %986 }
0x12f5   :  { %v989_v17 = vadd.f32 %v987_v16, %v979_v15 }
0x12f7   :  { %1666 = vtanh.f32 %v989_v17 }
0x1301   :  { %v1667_v35 = vpop.eup %1666 }
0x1302   :  { %992 = vrot.lane.b32.xlu1 %v1667_v35, %s1800_s15 }
0x1374   :  { %v993_v19 = vpop.permute.xlu1 %992 }
0x1375   :  { %v995_v20 = vmul.f32 %v1665_v11, %v993_v19 }
0x1377   :  { %997 = vrot.lane.b32.xlu0 %v995_v20, %s1803_s6 }
0x13e9   :  { %v998_v21 = vpop.permute.xlu0 %997 }
0x13ea   :  { %1001 = vst.msk [vmem:[#allocation3 + $0x30] sm:$0xff] %vm264_vm8, %v998_v21  ;;  %1512 = vmatmul.mubr.msk.f32.vlgmr.msra.gmra.mrb[12].mxu1 %vm264_vm8, %v998_v21 }
0x13f1   :  { %v1119_v23 = vld [vmem:[#allocation3 + $0x30] sm:$0xff] }
0x13f2   :  { %1531 = vmatprep.mubr.msk.f32.mxu0 %vm264_vm8, %v1119_v23 }
0x14bd   :  { %v1072_v24 = vpop.f32.mrb[12].mxu1 }
0x14be   :  { %v1076_v25 = vadd.f32 %v1072_v24, %v246_v13  ;;  %v1513_v26 = vpop.f32.mrb[13].mxu1 }
0x14c0   :  { %1668 = vtanh.f32 %v1076_v25  ;;  %v1338_v28 = vmul.f32 -1.442695, %v1076_v25 }
0x14c2   :  { %1670 = vpow2.f32 %v1338_v28 }
0x14ca   :  { %v1669_v27 = vpop.eup %1668 }
0x14cb   :  { %1086 = vrot.lane.b32.xlu1 %v1669_v27, %s1800_s15 }
0x14cc   :  { %v1671_v22 = vpop.eup %1670 }
0x14cd   :  { %v1080_v29 = vadd.f32 1.0, %v1671_v22 }
0x14cf   :  { %1672 = vrcp.f32 %v1080_v29 }
0x14d9   :  { %v1673_v18 = vpop.eup %1672 }
0x14da   :  { %v1084_v30 = vmul.f32 %v1673_v18, %v989_v17 }
0x153d   :  { %v1087_v31 = vpop.permute.xlu1 %1086 }
0x153e   :  { %v1089_v10 = vmul.f32 %v1673_v18, %v1087_v31 }
0x1540   :  { %1091 = vrot.lane.b32.xlu0 %v1089_v10, %s1800_s15 }
0x15b2   :  { %v1092_v32 = vpop.permute.xlu0 %1091 }
0x15b3   :  { %v1094_v37 = vadd.f32 %v1092_v32, %v1084_v30 }
0x15b5   :  { %1674 = vtanh.f32 %v1094_v37 }
0x15bf   :  { %v1675_v38 = vpop.eup %1674 }
0x15c0   :  { %1097 = vrot.lane.b32.xlu1 %v1675_v38, %s1800_s15  ;;  %s1720_s15 = scalar_lea.vmem %s1288_s1, 128 }
0x15c1   :  { %p1721_p2 = scmp.ne.s32.totalorder %s1288_s1, %s1720_s15  ;;  %p1726_p4 = scmp.lt.s32.totalorder %s1720_s15, %s1720_s15 }
0x15c3   :  { %p1727_p5 = por %p1726_p4, %p1725_p3 }
0x15c4   :  { %1109 = vrot.lane.b32.xlu1 %v1094_v37, %s1804_s5 }
0x15c5   :  { %p1728_p6 = pnand %p1727_p5, %p1721_p2 }
0x1632   :  { %v1098_v34 = vpop.permute.xlu1 %1097 }
0x1633   :  { %v1100_v33 = vmul.f32 %v1673_v18, %v1098_v34 }
0x1635   :  { %1102 = vrot.lane.b32.xlu0 %v1100_v33, %s1803_s6 }
0x1636   :  { %v1110_v36 = vpop.permute.xlu1 %1109 }
0x1637   :  { %1112 = vst.msk [vmem:[#allocation12] sm:$0xff] %vm264_vm8, %v1110_v36 }
0x16a7   :  { %v1103_v39 = vpop.permute.xlu0 %1102 }
0x16a8   :  { %1106 = vst.msk [vmem:[#allocation3 + $0x38] sm:$0xff] %vm264_vm8, %v1103_v39  ;;  %1107 = vst.msk [vmem:[#allocation10] sm:$0xff] %vm264_vm8, %v1103_v39 }
0x16af   :  { %v1120_v41 = vld [vmem:[#allocation3 + $0x38] sm:$0xff] }
0x16b0   :  { %1532 = vmatmul.mubr.msk.f32.gmra.mrb[16].mxu0 %vm264_vm8, %v1120_v41 }
0x16b1   :  { %1731 = shalt.err (!%p1728_p6)
}
0x16b2   :  { %s1732_s18 = scalar_lea.hbm %s2168_s9, 128 }
0x16b3   :  { %p1733_p7 = scmp.ne.s32.totalorder %s2168_s9, %s1732_s18  ;;  %p1736_p8 = scmp.lt.u32.totalorder %s1732_s18, %s2168_s9 }
0x16b5   :  { %p1738_p9 = pnand %p1736_p8, %p1733_p7 }
0x16b7   :  { %1741 = shalt.err (!%p1738_p9)
}
0x16b8   :  { %1290 = dma.vmem_to_hbm [thread:$0]  %s1288_s1, 128, %s2168_s9, [#allocation11]  }
0x16b9   :  { %s1806_s25 = smov [#allocation12]  }
0x16ba   :  { %s1297_s26 = sshll.u32 %s1806_s25, 4  ;;  %s1298_s26 = int_to_ptr.vmem [resolvable:$true] %s1297_s26 }
0x16bb   :  { %s1742_s2 = scalar_lea.vmem %s1298_s26, 128  ;;  %p1747_p11 = scmp.lt.s32.totalorder %s1298_s26, %s1298_s26 }
0x16bc   :  { %p1743_p10 = scmp.ne.s32.totalorder %s1298_s26, %s1742_s2  ;;  %p1748_p12 = scmp.lt.s32.totalorder %s1742_s2, %s1742_s2 }
0x16be   :  { %p1749_p13 = por %p1748_p12, %p1747_p11 }
0x16c0   :  { %p1750_p0 = pnand %p1749_p13, %p1743_p10 }
0x16c2   :  { %1753 = shalt.err (!%p1750_p0)
}
0x16c3   :  { %s1754_s28 = scalar_lea.hbm %s2169_s10, 128 }
0x16c4   :  { %p1755_p1 = scmp.ne.s32.totalorder %s2169_s10, %s1754_s28  ;;  %p1758_p2 = scmp.lt.u32.totalorder %s1754_s28, %s2169_s10 }
0x16c6   :  { %p1760_p3 = pnand %p1758_p2, %p1755_p1 }
0x16c8   :  { %1763 = shalt.err (!%p1760_p3)
}
0x16c9   :  { %1300 = dma.vmem_to_hbm [thread:$0]  %s1298_s26, 128, %s2169_s10, [#allocation11]  }
0x16ca   :  { %s1807_s4 = smov [#allocation9]  }
0x16cb   :  { %s1274_s16 = sshll.u32 %s1807_s4, 4  ;;  %s1275_s16 = int_to_ptr.vmem [resolvable:$true] %s1274_s16 }
0x16cc   :  { %s1764_s5 = scalar_lea.vmem %s1275_s16, 1024  ;;  %p1769_p5 = scmp.lt.s32.totalorder %s1275_s16, %s1275_s16 }
0x16cd   :  { %p1765_p4 = scmp.ne.s32.totalorder %s1275_s16, %s1764_s5  ;;  %p1770_p6 = scmp.lt.s32.totalorder %s1764_s5, %s1764_s5 }
0x16cf   :  { %p1771_p7 = por %p1770_p6, %p1769_p5 }
0x16d1   :  { %p1772_p8 = pnand %p1771_p7, %p1765_p4 }
0x1783   :  { %v1533_v42 = vpop.f32.mrb[16].mxu0 }
0x1784   :  { %v1258_v43 = vadd.f32 %v1533_v42, %v2092_v58  ;;  %v1252_v44 = vpop.f32.mrb[17].mxu0 }
0x1785   :  { %v1253_v45 = vadd.f32 %v2092_v58, %v1252_v44 }
0x1786   :  { %1268 = vst [vmem:[#allocation9 + $0x38] sm:$0xff] %v1258_v43 }
0x1787   :  { %1267 = vst [vmem:[#allocation9 + $0x30] sm:$0xff] %v1253_v45 }
0x1788   :  { %1775 = shalt.err (!%p1772_p8)
}
0x1789   :  { %s1776_s1 = scalar_lea.hbm %s2167_s8, 1024 }
0x178a   :  { %p1777_p9 = scmp.ne.s32.totalorder %s2167_s8, %s1776_s1  ;;  %p1780_p10 = scmp.lt.u32.totalorder %s1776_s1, %s2167_s8 }
0x178c   :  { %p1782_p11 = pnand %p1780_p10, %p1777_p9 }
0x178e   :  { %1785 = shalt.err (!%p1782_p11)
}
0x178f   :  { %1280 = dma.vmem_to_hbm [thread:$0]  %s1275_s16, 1024, %s2167_s8, [#allocation6], %s1795_s23, %s1795_s23, %s1796_s24  }
0x1790   :  { %1790 = dma.done.wait [#allocation6], 1024  }
0x1791   :  { %1791 = vsyncadd [#allocation6], 4294966272 }
0x1792   :  { %1792 = dma.done.wait [#allocation11], 256  }
0x1793   :  { %1793 = vsyncadd [#allocation11], 4294967040 }
0x1794   :  { %1310 = vsyncpa [#allocation5], 1 }
0x1795   :  { %1311 = vsyncpa [#allocation8], 1 }
0x1796   :  { %1312 = vsyncpa [#allocation6], 1 }
0x1797   :  { %1313 = vsyncpa [#allocation11], 1 }

</bundles_post_ra>
